<compile_context>
chip_gen: v7x
topology: tpu7x:2x2x1
jax: 0.10.0
libtpu: 0.0.40
codegen_flags: <defaults>
</compile_context>

<pallas_src>
import numpy as np
import jax
import jax.numpy as jnp
from jax import lax
from jax.experimental import pallas as pl
from jax.experimental.pallas import tpu as pltpu

# ----------------------------------------------------------------------------
# tunables
# ----------------------------------------------------------------------------
_G_TARGET = 512        # logical rows gathered per grid step
_ONEHOT_MAX_V = 2048   # max vocabulary size for the one-hot MXU gather path
_ROW_DMA_BLOCK = 8     # rows coalesced per output block on the row-DMA path
_CHUNK = 65536         # max indices per pallas_call (SMEM / recompile bound)


# ----------------------------------------------------------------------------
# helpers
# ----------------------------------------------------------------------------
def _round_up(x: int, m: int) -> int:
    return ((x + m - 1) // m) * m


def _vmem_capacity_bytes() -> int:
    """Physical VMEM of the local chip; conservative default if query fails."""
    try:
        cap = int(getattr(pltpu.get_tpu_info(), "vmem_capacity_bytes", 0))
        if cap > 0:
            return cap
    except Exception:
        pass
    return 64 * 1024 * 1024  # v7x physical VMEM (most restrictive)


def _lane_pack_factor(d: int) -> int:
    """How many embedding rows pack into one 128-lane output slab."""
    return (128 // d) if (0 < d < 128 and 128 % d == 0) else 1


# ----------------------------------------------------------------------------
# Path A: resident table + one-hot MXU gather (small V)
# ----------------------------------------------------------------------------
def _make_onehot_kernel(rows_per_block: int, p: int, d: int, v: int,
                        use_highest: bool):
    precision = lax.Precision.HIGHEST if use_highest else None

    def kernel(idx_ref, w_ref, o_ref):
        # idx_ref: VMEM (rows_per_block, p) int32
        # w_ref:   VMEM (v, d)  -- whole table, single resident copy
        # o_ref:   VMEM (rows_per_block, p*d)  -- lane-dense output block
        idx_blk = idx_ref[...]
        w = w_ref[...]
        iota_v = lax.broadcasted_iota(jnp.int32, (rows_per_block, v), 1)
        for k in range(p):                       # tiny static loop (<=16)
            col = idx_blk[:, k:k + 1]            # (rows_per_block, 1)
            onehot = (col == iota_v).astype(w.dtype)
            # MXU retires a whole block of rows per matmul; f32 accumulate,
            # HIGHEST precision keeps f32 weight selection (near-)exact.
            res = jnp.dot(onehot, w, preferred_element_type=jnp.float32,
                          precision=precision)
            o_ref[:, k * d:(k + 1) * d] = res.astype(o_ref.dtype)

    return kernel


def _onehot_lookup(weight, idx_pad, n, n_pad, G, p, vmem_limit):
    v, d = weight.shape
    rows_per_block = G // p
    lane_w = p * d
    num_blocks = n_pad // G
    idx2d = idx_pad.reshape(n_pad // p, p)
    use_highest = jnp.dtype(weight.dtype) == jnp.dtype(jnp.float32)
    sems = ("parallel",) if num_blocks >= 8 else ("arbitrary",)

    out = pl.pallas_call(
        _make_onehot_kernel(rows_per_block, p, d, v, use_highest),
        grid=(num_blocks,),
        in_specs=[
            pl.BlockSpec((rows_per_block, p), lambda i: (i, 0)),
            # whole table resident in VMEM, single copy (no double-buffering)
            pl.BlockSpec(memory_space=pltpu.MemorySpace.VMEM),
        ],
        out_specs=pl.BlockSpec((rows_per_block, lane_w), lambda i: (i, 0)),
        out_shape=jax.ShapeDtypeStruct((n_pad // p, lane_w), weight.dtype),
        compiler_params=pltpu.CompilerParams(
            dimension_semantics=sems, vmem_limit_bytes=vmem_limit),
    )(idx2d, weight)
    # (n_pad/p, p*d) and (n_pad, d) are the same row-major buffer -> free.
    return out.reshape(n_pad, d)[:n]


# ----------------------------------------------------------------------------
# Path B: resident table + scalar dynamic-sublane gather (larger V)
# ----------------------------------------------------------------------------
def _make_scalar_gather_kernel(G: int, rows_per_block: int, p: int, d: int):
    def kernel(idx_ref, w_ref, o_ref):
        # idx_ref: SMEM (n_pad,) int32 (scalar-prefetched, clamped)
        # w_ref:   VMEM (V, d)        (whole table, single resident copy)
        # o_ref:   VMEM (rows_per_block, p*d)
        base = pl.program_id(0) * G

        def body(q, carry):
            # TODO(synk): on v5e, staging 8 packed rows into an (8,128) tile and
            # issuing one full-vreg store would cut vst pressure further.
            for k in range(p):                   # static lane-slot loop
                r = idx_ref[base + q * p + k]
                o_ref[pl.ds(q, 1), k * d:(k + 1) * d] = w_ref[pl.ds(r, 1), :]
            return carry

        lax.fori_loop(0, rows_per_block, body, 0, unroll=8)

    return kernel


def _scalar_resident_lookup(weight, idx_pad, n, n_pad, G, p, vmem_limit):
    v, d = weight.shape
    rows_per_block = G // p
    lane_w = p * d
    num_blocks = n_pad // G
    sems = ("parallel",) if num_blocks >= 8 else ("arbitrary",)

    grid_spec = pltpu.PrefetchScalarGridSpec(
        num_scalar_prefetch=1,                   # indices -> SMEM
        grid=(num_blocks,),
        in_specs=[pl.BlockSpec(memory_space=pltpu.MemorySpace.VMEM)],
        out_specs=pl.BlockSpec((rows_per_block, lane_w),
                               lambda i, idx: (i, 0)),
    )
    out = pl.pallas_call(
        _make_scalar_gather_kernel(G, rows_per_block, p, d),
        grid_spec=grid_spec,
        out_shape=jax.ShapeDtypeStruct((n_pad // p, lane_w), weight.dtype),
        compiler_params=pltpu.CompilerParams(
            dimension_semantics=sems, vmem_limit_bytes=vmem_limit),
    )(idx_pad, weight)
    return out.reshape(n_pad, d)[:n]


# ----------------------------------------------------------------------------
# Path C: row-DMA gather (table does not fit VMEM, or tiny batch vs. big table)
# ----------------------------------------------------------------------------
def _make_row_dma_kernel(R: int):
    def kernel(idx_ref, w_row_ref, o_ref):
        del idx_ref                              # consumed by the index_maps
        i = pl.program_id(0)
        o_ref[pl.ds(lax.rem(i, R), 1), :] = w_row_ref[...]
    return kernel


def _row_dma_lookup(weight, idx, vmem_limit):
    # TODO(synk): a fully manual double-buffered make_async_copy gather
    # (memory_space=pl.ANY) would overlap the tiny per-row DMAs even better.
    n = idx.shape[0]
    v, d = weight.shape
    R = _ROW_DMA_BLOCK
    n_pad = _round_up(n, R)
    idx_p = jnp.pad(idx, (0, n_pad - n))         # pad with row 0 (valid)

    grid_spec = pltpu.PrefetchScalarGridSpec(
        num_scalar_prefetch=1,
        grid=(n_pad,),
        in_specs=[pl.BlockSpec((1, d), lambda i, idx_ref: (idx_ref[i], 0),
                               pipeline_mode=pl.Buffered(4))],
        out_specs=pl.BlockSpec((R, d), lambda i, idx_ref: (i // R, 0)),
    )
    out = pl.pallas_call(
        _make_row_dma_kernel(R),
        grid_spec=grid_spec,
        out_shape=jax.ShapeDtypeStruct((n_pad, d), weight.dtype),
        compiler_params=pltpu.CompilerParams(
            dimension_semantics=("arbitrary",),  # out block revisited 8x
            vmem_limit_bytes=vmem_limit),
    )(idx_p, weight)
    return out[:n]


# ----------------------------------------------------------------------------
# Path choice + chunking
# ----------------------------------------------------------------------------
def _lookup_chunk(weight, idx, path, vmem_limit):
    n = int(idx.shape[0])
    v, d = weight.shape
    itemsize = jnp.dtype(weight.dtype).itemsize

    p = _lane_pack_factor(d)
    align = 8 * p
    G = _round_up(min(_G_TARGET, _round_up(n, align)), align)
    n_pad = _round_up(n, G)

    table_bytes = v * d * itemsize
    out_block_bytes = G * d * itemsize
    # Single resident table copy (memory_space=VMEM) + double-buffered output
    # blocks + headroom for index blocks / one-hot transients.
    resident_fits = (table_bytes + 2 * out_block_bytes + (4 << 20)) <= vmem_limit
    # n-vs-V heuristic: tiny batch against a big table -> read only n rows.
    small_batch = (n * d * itemsize) * 8 < table_bytes

    if path == "row_dma" or (path == "auto" and (not resident_fits or small_batch)):
        return _row_dma_lookup(weight, idx, vmem_limit)

    idx_pad = jnp.pad(idx, (0, n_pad - n))       # pad with row 0 (valid)
    if path == "scalar" or (path == "auto" and v > _ONEHOT_MAX_V):
        return _scalar_resident_lookup(weight, idx_pad, n, n_pad, G, p, vmem_limit)
    return _onehot_lookup(weight, idx_pad, n, n_pad, G, p, vmem_limit)


def embedding_lookup(weight: jax.Array, flat_indices: jax.Array,
                     *, path: str = "auto") -> jax.Array:
    """Gather rows of `weight` at `flat_indices` with Pallas TPU kernels.

    weight:       (num_embeddings, embedding_dim)
    flat_indices: (n,) integer
    path:         "auto" | "onehot" | "scalar" | "row_dma" (testing override)
    returns:      (n, embedding_dim)
    """
    n = int(flat_indices.shape[0])
    v, d = weight.shape
    if n == 0:
        return jnp.zeros((0, d), weight.dtype)

    # Clamp to valid range (jnp.take semantics; torch.nn.Embedding would raise).
    flat_indices = jnp.clip(flat_indices.astype(jnp.int32), 0, v - 1)

    vmem_limit = int(_vmem_capacity_bytes() * 3 // 4)

    if n <= _CHUNK:
        return _lookup_chunk(weight, flat_indices, path, vmem_limit)
    # Chunk very large batches: bounds SMEM padding of the prefetched index
    # array (next_pow2(4*n)) and recompilation from huge/varying grid sizes.
    outs = [_lookup_chunk(weight, flat_indices[s:s + _CHUNK], path, vmem_limit)
            for s in range(0, n, _CHUNK)]
    return jnp.concatenate(outs, axis=0)


# ----------------------------------------------------------------------------
# Module-equivalent wrapper (parameter setup + shape glue in plain JAX)
# ----------------------------------------------------------------------------
def process_shape(dim, shape):
    if shape is None and dim is None:
        raise ValueError("Missing both, shape and embedding_dim")
    elif shape is not None and dim is not None:
        raise ValueError("Provided both, shape and embedding_dim")
    elif shape is None and dim is not None:
        shape = (dim,)
    elif isinstance(shape, int) and dim is None:
        dim = shape
        shape = (shape,)
    else:
        shape = tuple(shape)
        dim = int(np.prod(shape))
    return dim, shape


class Embedding:
    """JAX/Pallas drop-in for pykeen.nn.emb.Embedding (default options).

    Pass dtype=jnp.bfloat16 to halve table HBM/VMEM footprint (doubles the
    resident-path capacity on v7x's 64 MiB VMEM); lookup stays exact.
    """

    def __init__(self, num_embeddings, embedding_dim=None, shape=None,
                 dtype=jnp.float32, key=None):
        dim, shape = process_shape(embedding_dim, shape)
        self.max_id = int(num_embeddings)
        self.shape = tuple(shape)
        self._embedding_dim = int(dim)
        if key is None:
            key = jax.random.PRNGKey(0)
        # Default pykeen initializer is nn.init.normal_ (mean=0, std=1).
        self.weight = jax.random.normal(
            key, (self.max_id, self._embedding_dim), dtype=dtype)
        # TODO(synk): normalizer / constrainer / regularizer / dropout hooks are
        # None by default in the reference module; not implemented here.

    def __call__(self, indices=None):
        if indices is None:
            return self.weight.reshape(self.max_id, *self.shape)
        indices = jnp.asarray(indices)
        prefix_shape = indices.shape
        flat = indices.reshape(-1)
        x = embedding_lookup(self.weight, flat)       # Pallas gather hot path
        return x.reshape(*prefix_shape, *self.shape)


# ----------------------------------------------------------------------------
if __name__ == "__main__":
    num_embeddings = 16
    embedding_dim = 32

    emb = Embedding(num_embeddings=num_embeddings, embedding_dim=embedding_dim,
                    key=jax.random.PRNGKey(0))

    # 2-D index tensor (b, n) = (2, 3), as used by sLCWA scoring.
    indices = jax.random.randint(jax.random.PRNGKey(1), (2, 3), 0,
                                 num_embeddings, dtype=jnp.int32)
    out = jax.block_until_ready(emb(indices))
    ref = jnp.take(emb.weight, indices.reshape(-1), axis=0).reshape(
        *indices.shape, *emb.shape)
    assert out.shape == (2, 3, embedding_dim), out.shape
    np.testing.assert_allclose(np.asarray(out), np.asarray(ref),
                               rtol=1e-6, atol=1e-6)

    # 1-D indices and the indices=None path.
    out1 = jax.block_until_ready(emb(jnp.arange(5, dtype=jnp.int32)))
    assert out1.shape == (5, embedding_dim)
    np.testing.assert_allclose(np.asarray(out1), np.asarray(emb.weight[:5]),
                               rtol=1e-6, atol=1e-6)
    out_all = jax.block_until_ready(emb(None))
    assert out_all.shape == (num_embeddings, embedding_dim)

    # Out-of-range indices are clamped (jnp.take-style).
    oob = jnp.array([[0, 15], [16, 100]], dtype=jnp.int32)
    out_oob = jax.block_until_ready(emb(oob))
    ref_oob = jnp.take(emb.weight, jnp.clip(oob.reshape(-1), 0, 15),
                       axis=0).reshape(2, 2, embedding_dim)
    np.testing.assert_allclose(np.asarray(out_oob), np.asarray(ref_oob),
                               rtol=1e-6, atol=1e-6)

    # p == 1 one-hot path (embedding_dim = 160 does not pack into 128 lanes).
    emb2 = Embedding(num_embeddings=12, embedding_dim=160,
                     key=jax.random.PRNGKey(2))
    idx2 = jax.random.randint(jax.random.PRNGKey(3), (7,), 0, 12, jnp.int32)
    out2 = jax.block_until_ready(emb2(idx2))
    np.testing.assert_allclose(np.asarray(out2),
                               np.asarray(jnp.take(emb2.weight, idx2, axis=0)),
                               rtol=1e-6, atol=1e-6)

    # bf16 table (exact selection through the MXU one-hot path).
    emb3 = Embedding(num_embeddings=16, embedding_dim=64, dtype=jnp.bfloat16,
                     key=jax.random.PRNGKey(4))
    idx3 = jax.random.randint(jax.random.PRNGKey(5), (4,), 0, 16, jnp.int32)
    out3 = jax.block_until_ready(emb3(idx3))
    np.testing.assert_allclose(
        np.asarray(out3, dtype=np.float32),
        np.asarray(jnp.take(emb3.weight, idx3, axis=0), dtype=np.float32),
        rtol=0, atol=0)

    flat = indices.reshape(-1)
    ref_flat = np.asarray(jnp.take(emb.weight, flat, axis=0))

    # Scalar resident-gather path (exact) forced on the small table.
    out_sc = jax.block_until_ready(
        embedding_lookup(emb.weight, flat, path="scalar"))
    np.testing.assert_allclose(np.asarray(out_sc), ref_flat, rtol=0, atol=0)

    # Row-DMA fallback path (exact) forced on the small table.
    out_fb = jax.block_until_ready(
        embedding_lookup(emb.weight, flat, path="row_dma"))
    np.testing.assert_allclose(np.asarray(out_fb), ref_flat, rtol=0, atol=0)

    print("KERNEL_OK")
</pallas_src>

<mosaic_0001>
module attributes {stable_mosaic.version = 11 : i64} {
  func.func @kernel(%arg0: i32, %arg1: memref<8x4xi32, #tpu.memory_space<vmem>>, %arg2: memref<16x32xf32, #tpu.memory_space<vmem>>, %arg3: memref<8x128xf32, #tpu.memory_space<vmem>>) attributes {dimension_semantics = [#tpu.dimension_semantics<arbitrary>], iteration_bounds = array<i64: 1>, scalar_prefetch = 0 : i64, scratch_operands = 0 : i64, tpu.core_type = #tpu.core_type<tc>, window_params = [{transform_indices = @transform_0, window_bounds = array<i64: 8, 4>}, {pipeline_mode = #tpu.pipeline_mode<synchronous>, transform_indices = @transform_1, window_bounds = array<i64: 16, 32>}, {transform_indices = @transform_2, window_bounds = array<i64: 8, 128>}]} {
    %c0 = arith.constant 0 : index
    %c0_0 = arith.constant 0 : index
    %0 = vector.load %arg1[%c0, %c0_0] : memref<8x4xi32, #tpu.memory_space<vmem>>, vector<8x4xi32>
    %c0_1 = arith.constant 0 : index
    %c0_2 = arith.constant 0 : index
    %1 = vector.load %arg2[%c0_1, %c0_2] : memref<16x32xf32, #tpu.memory_space<vmem>>, vector<16x32xf32>
    %2 = tpu.iota {dimensions = array<i32: 1>} : vector<8x16xi32>
    %3 = vector.extract_strided_slice %0 {offsets = [0, 0], sizes = [8, 1], strides = [1, 1]} : vector<8x4xi32> to vector<8x1xi32>
    %4 = vector.broadcast %3 : vector<8x1xi32> to vector<8x16xi32>
    %5 = arith.cmpi eq, %4, %2 : vector<8x16xi32>
    %6 = arith.extui %5 : vector<8x16xi1> to vector<8x16xi32>
    %7 = arith.sitofp %6 : vector<8x16xi32> to vector<8x16xf32>
    %cst = arith.constant dense<0.000000e+00> : vector<8x32xf32>
    %8 = tpu.matmul %7, %1, %cst {dimension_numbers = #tpu.dot_dimension_numbers<[1], [0], [0], [1], [0, 0, 1, 1], [], []>, precision = #tpu.contract_precision<fp32>} : vector<8x16xf32>, vector<16x32xf32>, vector<8x32xf32> -> vector<8x32xf32>
    %c0_3 = arith.constant 0 : index
    %c0_4 = arith.constant 0 : index
    %9 = vector.load %arg3[%c0_3, %c0_4] : memref<8x128xf32, #tpu.memory_space<vmem>>, vector<8x32xf32>
    tpu.vector_store %arg3[%c0_3, %c0_4], %8 {strides = array<i32>} : memref<8x128xf32, #tpu.memory_space<vmem>>, vector<8x32xf32>,
    %10 = vector.extract_strided_slice %0 {offsets = [0, 1], sizes = [8, 1], strides = [1, 1]} : vector<8x4xi32> to vector<8x1xi32>
    %11 = vector.broadcast %10 : vector<8x1xi32> to vector<8x16xi32>
    %12 = arith.cmpi eq, %11, %2 : vector<8x16xi32>
    %13 = arith.extui %12 : vector<8x16xi1> to vector<8x16xi32>
    %14 = arith.sitofp %13 : vector<8x16xi32> to vector<8x16xf32>
    %cst_5 = arith.constant dense<0.000000e+00> : vector<8x32xf32>
    %15 = tpu.matmul %14, %1, %cst_5 {dimension_numbers = #tpu.dot_dimension_numbers<[1], [0], [0], [1], [0, 0, 1, 1], [], []>, precision = #tpu.contract_precision<fp32>} : vector<8x16xf32>, vector<16x32xf32>, vector<8x32xf32> -> vector<8x32xf32>
    %c0_6 = arith.constant 0 : index
    %c32 = arith.constant 32 : index
    %16 = vector.load %arg3[%c0_6, %c32] : memref<8x128xf32, #tpu.memory_space<vmem>>, vector<8x32xf32>
    tpu.vector_store %arg3[%c0_6, %c32], %15 {strides = array<i32>} : memref<8x128xf32, #tpu.memory_space<vmem>>, vector<8x32xf32>,
    %17 = vector.extract_strided_slice %0 {offsets = [0, 2], sizes = [8, 1], strides = [1, 1]} : vector<8x4xi32> to vector<8x1xi32>
    %18 = vector.broadcast %17 : vector<8x1xi32> to vector<8x16xi32>
    %19 = arith.cmpi eq, %18, %2 : vector<8x16xi32>
    %20 = arith.extui %19 : vector<8x16xi1> to vector<8x16xi32>
    %21 = arith.sitofp %20 : vector<8x16xi32> to vector<8x16xf32>
    %cst_7 = arith.constant dense<0.000000e+00> : vector<8x32xf32>
    %22 = tpu.matmul %21, %1, %cst_7 {dimension_numbers = #tpu.dot_dimension_numbers<[1], [0], [0], [1], [0, 0, 1, 1], [], []>, precision = #tpu.contract_precision<fp32>} : vector<8x16xf32>, vector<16x32xf32>, vector<8x32xf32> -> vector<8x32xf32>
    %c0_8 = arith.constant 0 : index
    %c64 = arith.constant 64 : index
    %23 = vector.load %arg3[%c0_8, %c64] : memref<8x128xf32, #tpu.memory_space<vmem>>, vector<8x32xf32>
    tpu.vector_store %arg3[%c0_8, %c64], %22 {strides = array<i32>} : memref<8x128xf32, #tpu.memory_space<vmem>>, vector<8x32xf32>,
    %24 = vector.extract_strided_slice %0 {offsets = [0, 3], sizes = [8, 1], strides = [1, 1]} : vector<8x4xi32> to vector<8x1xi32>
    %25 = vector.broadcast %24 : vector<8x1xi32> to vector<8x16xi32>
    %26 = arith.cmpi eq, %25, %2 : vector<8x16xi32>
    %27 = arith.extui %26 : vector<8x16xi1> to vector<8x16xi32>
    %28 = arith.sitofp %27 : vector<8x16xi32> to vector<8x16xf32>
    %cst_9 = arith.constant dense<0.000000e+00> : vector<8x32xf32>
    %29 = tpu.matmul %28, %1, %cst_9 {dimension_numbers = #tpu.dot_dimension_numbers<[1], [0], [0], [1], [0, 0, 1, 1], [], []>, precision = #tpu.contract_precision<fp32>} : vector<8x16xf32>, vector<16x32xf32>, vector<8x32xf32> -> vector<8x32xf32>
    %c0_10 = arith.constant 0 : index
    %c96 = arith.constant 96 : index
    %30 = vector.load %arg3[%c0_10, %c96] : memref<8x128xf32, #tpu.memory_space<vmem>>, vector<8x32xf32>
    tpu.vector_store %arg3[%c0_10, %c96], %29 {strides = array<i32>} : memref<8x128xf32, #tpu.memory_space<vmem>>, vector<8x32xf32>,
    return
  }
  func.func @transform_0(%arg0: i32) -> (i32, i32) {
    %c0_i32 = arith.constant 0 : i32
    %c0_i32_0 = arith.constant 0 : i32
    return %arg0, %c0_i32 : i32, i32
  }
  func.func @transform_1(%arg0: i32) -> (i32, i32) {
    %c0_i32 = arith.constant 0 : i32
    %c0_i32_0 = arith.constant 0 : i32
    %c0_i32_1 = arith.constant 0 : i32
    return %c0_i32, %c0_i32_0 : i32, i32
  }
  func.func @transform_2(%arg0: i32) -> (i32, i32) {
    %c0_i32 = arith.constant 0 : i32
    %c0_i32_0 = arith.constant 0 : i32
    return %arg0, %c0_i32 : i32, i32
  }
}

</mosaic_0001>

<bundles_post_ra>
// kernel: tpu_custom_call.1
= control target key start
LH: loop header
LB: loop body
LE: loop exit
PB: predicated region body
PF: predicated region fallthrough
CT: control target
= control target key end

     0   :  { %7 = vsyncpa [#allocation3], 0  ;;  %s2578_s0 = inlined_call_operand.vmem [shape: s32[8,4], index: 0, kind: input, shape index: {}]   ;;  %s2579_s1 = inlined_call_operand.hbm [shape: f32[16,32], index: 1, kind: input, shape index: {}]   ;;  %s2580_s2 = inlined_call_operand.hbm [shape: f32[8,128], index: 2, kind: output, shape index: {}]  }
   0x1   :  { %8 = vsyncpa [#allocation4], 0  ;;  %s2374_s9 = smov [#allocation2]   ;;  %s2326_s13 = scalar_lea.hbm %s2579_s1, 256 }
   0x2   :  { %s16_s10 = sshll.u32 %s2374_s9, 4  ;;  %p2327_p0 = scmp.ne.s32.totalorder %s2579_s1, %s2326_s13  ;;  %s17_s10 = int_to_ptr.vmem [resolvable:$true] %s16_s10 }
   0x3   :  { %p2330_p1 = scmp.lt.u32.totalorder %s2326_s13, %s2579_s1 }
   0x5   :  { %p2332_p2 = pnand %p2330_p1, %p2327_p0 }
   0x7   :  { %2335 = shalt.err (!%p2332_p2)
}
   0x8   :  { %s2336_s18 = scalar_lea.vmem %s17_s10, 256  ;;  %p2341_p4 = scmp.lt.s32.totalorder %s17_s10, %s17_s10 }
   0x9   :  { %p2337_p3 = scmp.ne.s32.totalorder %s17_s10, %s2336_s18  ;;  %p2342_p5 = scmp.lt.s32.totalorder %s2336_s18, %s2336_s18 }
   0xb   :  { %p2343_p6 = por %p2342_p5, %p2341_p4 }
   0xd   :  { %p2344_p7 = pnand %p2343_p6, %p2337_p3 }
   0xf   :  { %2347 = shalt.err (!%p2344_p7)
}
  0x10   :  { %s2375_s19 = smov 128   ;;  %s2376_s20 = smov 8  }
  0x11   :  { %22 = dma.hbm_to_vmem [thread:$0]  %s2579_s1, 256, %s17_s10, [#allocation3], %s2375_s19, %s2375_s19, %s2376_s20  }
  0x12   :  { %2370 = dma.done.wait [#allocation3], 256  }
  0x13   :  { %2371 = vsyncadd [#allocation3], 4294967040  ;;  %v2377_v0 = vmov 0   ;;  %v2378_v1 = vmov 2   ;;  %v26_v2 = vld [vmem:[%s2578_s0] sm:$0xff]  ;;  %v28_v4 = vld [vmem:[#allocation2 + $0x8] sm:$0xff]  ;;  %v29_v23 = vlaneseq }
  0x14   :  { %2321 = vset.pattern.permute.xlu0 %v2377_v0  ;;  %2323 = vset.pattern.permute.xlu1 %v2378_v1  ;;  %v27_v3 = vld [vmem:[#allocation2] sm:$0xff]  ;;  %v2379_v5 = vmov 1   ;;  %v2380_v6 = vmov 3   ;;  %v45_v8 = vand.u32 4294901760, %v28_v4  ;;  %v2381_v12 = vmov 0.0|0.0   ;;  %s2384_s0 = smov 32  }
  0x15   :  { %32 = vperm.xlu0 %2321, %v26_v2   ;;  %977 = vperm.xlu1 %2323, %v26_v2   ;;  %v42_v7 = vand.u32 4294901760, %v27_v3  ;;  %vm2382_vm0 = vmmov 0   ;;  %v2383_v15 = vmov 0.0   ;;  %v30_v24 = vand.u32 127, %v29_v23  ;;  %s2385_s1 = smov 64   ;;  %s2386_s25 = smov 96  }
  0x16   :  { %v127_v11 = vsub.f32 %v28_v4, %v45_v8  ;;  %2195 = vmatprep.subr.bf16.mxu0 %v2381_v12  ;;  %2213 = vmatprep.subr.bf16.mxu1 %v2381_v12  ;;  %vm37_vm1 = vcmask 130048   ;;  %vm500_vm6 = vcmask 261120   ;;  %vm974_vm7 = vcmask 523520   ;;  %s2387_s26 = smov [#allocation5]  }
  0x17   :  { %v2418_v9 = vpack.c.bf16 %v45_v8, %v42_v7  ;;  %v120_v10 = vsub.f32 %v27_v3, %v42_v7  ;;  %2031 = vmatprep.mubr.msk.f32.mxu0 %vm2382_vm0, %v2383_v15  ;;  %2073 = vmatprep.mubr.msk.f32.mxu1 %vm2382_vm0, %v2383_v15  ;;  %vm1448_vm8 = vcmask 785920   ;;  %s1930_s27 = sshll.u32 %s2387_s26, 4  ;;  %vm1922_vm9 = vcmask 1048320   ;;  %s1931_s27 = int_to_ptr.vmem [resolvable:$true] %s1930_s27 }
  0x18   :  { %v128_v14 = vand.u32 4294901760, %v127_v11  ;;  %s2348_s28 = scalar_lea.vmem %s1931_s27, 128  ;;  %p2353_p9 = scmp.lt.s32.totalorder %s1931_s27, %s1931_s27 }
  0x19   :  { %2322 = vset.pattern.permute.xlu0 %v2379_v5  ;;  %2324 = vset.pattern.permute.xlu1 %v2380_v6  ;;  %v121_v13 = vand.u32 4294901760, %v120_v10  ;;  %v2432_v21 = vpack.c.bf16 %v127_v11, %v120_v10  ;;  %p2349_p8 = scmp.ne.s32.totalorder %s1931_s27, %s2348_s28  ;;  %p2354_p10 = scmp.lt.s32.totalorder %s2348_s28, %s2348_s28 }
  0x1a   :  { %503 = vperm.xlu0 %2322, %v26_v2   ;;  %1451 = vperm.xlu1 %2324, %v26_v2   ;;  %v129_v17 = vsub.f32 %v127_v11, %v128_v14 }
  0x1b   :  { %2197 = vmatpush3.bf16.msra.mxu0 %v2418_v9  ;;  %2215 = vmatpush3.bf16.msra.mxu1 %v2418_v9  ;;  %v122_v16 = vsub.f32 %v120_v10, %v121_v13  ;;  %v2434_v22 = vpack.c.bf16 %v128_v14, %v121_v13  ;;  %p2355_p11 = por %p2354_p10, %p2353_p9 }
  0x1c   :  { %2198 = vmatprep.subr.bf16.mxu0 %v2381_v12  ;;  %2216 = vmatprep.subr.bf16.mxu1 %v2381_v12  ;;  %v130_v19 = vand.u32 4294901760, %v129_v17 }
  0x1d   :  { %v123_v18 = vand.u32 4294901760, %v122_v16  ;;  %p2356_p12 = pnand %p2355_p11, %p2349_p8 }
  0x1e   :  { %2325 = vset.pattern.permute.xlu0 %v2380_v6 }
  0x1f   :  { %v2430_v20 = vpack.c.bf16 %v130_v19, %v123_v18 }
  0x94   :  { %v33_v25 = vpop.permute.xlu0 %32  ;;  %v978_v39 = vpop.permute.xlu1 %977 }
  0x95   :  { %vm34_vm2 = vcmp.eq.s32.totalorder %v33_v25, %v30_v24  ;;  %vm979_vm4 = vcmp.eq.s32.totalorder %v978_v39, %v30_v24 }
  0x96   :  { %v2437_v26 = vsel %vm34_vm2, 1.0, %v2383_v15  ;;  %v2475_v41 = vsel %vm979_vm4, 1.0, %v2383_v15 }
  0x97   :  { %v39_v27 = vsel %vm37_vm1, %v2437_v26, 0  ;;  %v983_v42 = vsel %vm37_vm1, %v2475_v41, 0 }
  0x98   :  { %v109_v28 = vsub.f32 %v39_v27, %v39_v27  ;;  %v1053_v44 = vsub.f32 %v983_v42, %v983_v42 }
  0x99   :  { %v504_v29 = vpop.permute.xlu0 %503  ;;  %v1452_v40 = vpop.permute.xlu1 %1451 }
  0x9a   :  { %vm505_vm3 = vcmp.eq.s32.totalorder %v504_v29, %v30_v24  ;;  %v110_v30 = vand.u32 4294901760, %v109_v28  ;;  %vm1453_vm5 = vcmp.eq.s32.totalorder %v1452_v40, %v30_v24  ;;  %v1054_v46 = vand.u32 4294901760, %v1053_v44 }
  0x9b   :  { %v2442_v31 = vsel %vm505_vm3, 1.0, %v2383_v15  ;;  %v2484_v43 = vsel %vm1453_vm5, 1.0, %v2383_v15 }
  0x9c   :  { %v509_v32 = vsel %vm37_vm1, %v2442_v31, 0  ;;  %v111_v33 = vsub.f32 %v109_v28, %v110_v30  ;;  %v1457_v45 = vsel %vm37_vm1, %v2484_v43, 0  ;;  %v1055_v48 = vsub.f32 %v1053_v44, %v1054_v46 }
  0x9d   :  { %v579_v34 = vsub.f32 %v509_v32, %v509_v32  ;;  %v1527_v47 = vsub.f32 %v1457_v45, %v1457_v45 }
  0x9e   :  { %v112_v35 = vand.u32 4294901760, %v111_v33  ;;  %v1056_v50 = vand.u32 4294901760, %v1055_v48 }
  0x9f   :  { %v580_v36 = vand.u32 4294901760, %v579_v34  ;;  %v1528_v49 = vand.u32 4294901760, %v1527_v47 }
  0xa0   :  { %2032 = vmatmul.mubr.f32.vlgmr.msra.gmra.mrb[0].mxu0 %v112_v35 }
  0xa1   :  { %2200 = vmatpush3.bf16.msra.mxu0 %v2430_v20  ;;  %v581_v37 = vsub.f32 %v579_v34, %v580_v36  ;;  %2038 = vmatprep.mubr.msk.f32.mxu0 %vm2382_vm0, %v2383_v15  ;;  %v1529_v51 = vsub.f32 %v1527_v47, %v1528_v49 }
  0xa2   :  { %2201 = vmatprep.subr.bf16.mxu0 %v2381_v12 }
  0xa3   :  { %v582_v38 = vand.u32 4294901760, %v581_v37  ;;  %v1530_v52 = vand.u32 4294901760, %v1529_v51 }
  0xa5   :  { %2074 = vmatmul.mubr.f32.vlgmr.msra.gmra.mrb[0].mxu1 %v582_v38 }
  0xa6   :  { %2218 = vmatpush3.bf16.msra.mxu1 %v2430_v20  ;;  %2080 = vmatprep.mubr.msk.f32.mxu1 %vm2382_vm0, %v2383_v15 }
  0xa7   :  { %2219 = vmatprep.subr.bf16.mxu1 %v2381_v12 }
  0xa8   :  { %2039 = vmatmul.mubr.msk.f32.vlgmr.msra.gmra.mrb[0].mxu0 %vm37_vm1, %v2437_v26 }
  0xa9   :  { %2203 = vmatpush3.bf16.msra.mxu0 %v2432_v21  ;;  %2045 = vmatprep.mubr.msk.f32.mxu0 %vm2382_vm0, %v2383_v15 }
  0xaa   :  { %2204 = vmatprep.subr.bf16.mxu0 %v2381_v12 }
  0xad   :  { %2081 = vmatmul.mubr.msk.f32.vlgmr.msra.gmra.mrb[0].mxu1 %vm37_vm1, %v2442_v31 }
  0xae   :  { %2221 = vmatpush3.bf16.msra.mxu1 %v2432_v21  ;;  %2087 = vmatprep.mubr.msk.f32.mxu1 %vm2382_vm0, %v2383_v15 }
  0xaf   :  { %2222 = vmatprep.subr.bf16.mxu1 %v2381_v12 }
  0xb0   :  { %2046 = vmatmul.mubr.f32.vlgmr.msra.gmra.mrb[0].mxu0 %v109_v28 }
  0xb1   :  { %2206 = vmatpush3.bf16.msra.mxu0 %v2418_v9  ;;  %2052 = vmatprep.mubr.msk.f32.mxu0 %vm2382_vm0, %v2383_v15 }
  0xb2   :  { %2207 = vmatprep.subr.bf16.mxu0 %v2381_v12 }
  0xb5   :  { %2088 = vmatmul.mubr.f32.vlgmr.msra.gmra.mrb[0].mxu1 %v579_v34 }
  0xb6   :  { %2224 = vmatpush3.bf16.msra.mxu1 %v2418_v9  ;;  %2094 = vmatprep.mubr.msk.f32.mxu1 %vm2382_vm0, %v2383_v15 }
  0xb7   :  { %2225 = vmatprep.subr.bf16.mxu1 %v2381_v12 }
  0xb8   :  { %2053 = vmatmul.mubr.f32.vlgmr.msra.gmra.mrb[0].mxu0 %v110_v30 }
  0xb9   :  { %2209 = vmatpush3.bf16.msra.mxu0 %v2434_v22  ;;  %2059 = vmatprep.mubr.msk.f32.mxu0 %vm2382_vm0, %v2383_v15 }
  0xba   :  { %2210 = vmatprep.subr.bf16.mxu0 %v2381_v12 }
  0xbd   :  { %2095 = vmatmul.mubr.f32.vlgmr.msra.gmra.mrb[0].mxu1 %v580_v36 }
  0xbe   :  { %2227 = vmatpush3.bf16.msra.mxu1 %v2434_v22  ;;  %2101 = vmatprep.mubr.msk.f32.mxu1 %vm2382_vm0, %v2383_v15 }
  0xbf   :  { %2228 = vmatprep.subr.bf16.mxu1 %v2381_v12 }
  0xc0   :  { %2060 = vmatmul.mubr.msk.f32.vlgmr.msra.gmra.mrb[0].mxu0 %vm37_vm1, %v2437_v26 }
  0xc1   :  { %2212 = vmatpush3.bf16.msra.mxu0 %v2418_v9  ;;  %2066 = vmatprep.mubr.msk.f32.mxu0 %vm2382_vm0, %v2383_v15 }
  0xc2   :  { %2231 = vmatprep.subr.bf16.mxu0 %v2381_v12 }
  0xc5   :  { %2102 = vmatmul.mubr.msk.f32.vlgmr.msra.gmra.mrb[0].mxu1 %vm37_vm1, %v2442_v31 }
  0xc6   :  { %2230 = vmatpush3.bf16.msra.mxu1 %v2418_v9  ;;  %2108 = vmatprep.mubr.msk.f32.mxu1 %vm2382_vm0, %v2383_v15 }
  0xc7   :  { %2249 = vmatprep.subr.bf16.mxu1 %v2381_v12 }
  0xc8   :  { %2067 = vmatmul.mubr.msk.f32.vlgmr.msra.gmra.mrb[0].mxu0 %vm37_vm1, %v2437_v26 }
  0xc9   :  { %2233 = vmatpush3.bf16.msra.mxu0 %v2418_v9  ;;  %2115 = vmatprep.mubr.msk.f32.mxu0 %vm2382_vm0, %v2383_v15 }
  0xca   :  { %2234 = vmatprep.subr.bf16.mxu0 %v2381_v12 }
  0xcc   :  { %2116 = vmatmul.mubr.f32.vlgmr.msra.gmra.mrb[2].mxu0 %v1056_v50 }
  0xcd   :  { %2109 = vmatmul.mubr.msk.f32.vlgmr.msra.gmra.mrb[0].mxu1 %vm37_vm1, %v2442_v31  ;;  %2236 = vmatpush3.bf16.msra.mxu0 %v2430_v20 }
  0xce   :  { %2251 = vmatpush3.bf16.msra.mxu1 %v2418_v9  ;;  %2157 = vmatprep.mubr.msk.f32.mxu1 %vm2382_vm0, %v2383_v15 }
  0xcf   :  { %2252 = vmatprep.subr.bf16.mxu1 %v2381_v12  ;;  %2122 = vmatprep.mubr.msk.f32.mxu0 %vm2382_vm0, %v2383_v15 }
  0xd0   :  { %2237 = vmatprep.subr.bf16.mxu0 %v2381_v12 }
  0xd1   :  { %2158 = vmatmul.mubr.f32.vlgmr.msra.gmra.mrb[2].mxu1 %v1530_v52 }
  0xd2   :  { %2254 = vmatpush3.bf16.msra.mxu1 %v2430_v20  ;;  %2164 = vmatprep.mubr.msk.f32.mxu1 %vm2382_vm0, %v2383_v15 }
  0xd3   :  { %2255 = vmatprep.subr.bf16.mxu1 %v2381_v12 }
  0xd4   :  { %2123 = vmatmul.mubr.msk.f32.vlgmr.msra.gmra.mrb[2].mxu0 %vm37_vm1, %v2475_v41 }
  0xd5   :  { %2239 = vmatpush3.bf16.msra.mxu0 %v2432_v21  ;;  %2129 = vmatprep.mubr.msk.f32.mxu0 %vm2382_vm0, %v2383_v15 }
  0xd6   :  { %2240 = vmatprep.subr.bf16.mxu0 %v2381_v12 }
  0xd9   :  { %2165 = vmatmul.mubr.msk.f32.vlgmr.msra.gmra.mrb[2].mxu1 %vm37_vm1, %v2484_v43 }
  0xda   :  { %2257 = vmatpush3.bf16.msra.mxu1 %v2432_v21  ;;  %2171 = vmatprep.mubr.msk.f32.mxu1 %vm2382_vm0, %v2383_v15 }
  0xdb   :  { %2258 = vmatprep.subr.bf16.mxu1 %v2381_v12 }
  0xdc   :  { %2130 = vmatmul.mubr.f32.vlgmr.msra.gmra.mrb[2].mxu0 %v1053_v44 }
  0xdd   :  { %2242 = vmatpush3.bf16.msra.mxu0 %v2418_v9  ;;  %2136 = vmatprep.mubr.msk.f32.mxu0 %vm2382_vm0, %v2383_v15 }
  0xde   :  { %2243 = vmatprep.subr.bf16.mxu0 %v2381_v12 }
  0xe1   :  { %2172 = vmatmul.mubr.f32.vlgmr.msra.gmra.mrb[2].mxu1 %v1527_v47 }
  0xe2   :  { %2260 = vmatpush3.bf16.msra.mxu1 %v2418_v9  ;;  %2178 = vmatprep.mubr.msk.f32.mxu1 %vm2382_vm0, %v2383_v15 }
  0xe3   :  { %2261 = vmatprep.subr.bf16.mxu1 %v2381_v12 }
  0xe4   :  { %2137 = vmatmul.mubr.f32.vlgmr.msra.gmra.mrb[2].mxu0 %v1054_v46 }
  0xe5   :  { %2245 = vmatpush3.bf16.msra.mxu0 %v2434_v22  ;;  %2143 = vmatprep.mubr.msk.f32.mxu0 %vm2382_vm0, %v2383_v15 }
  0xe6   :  { %2246 = vmatprep.subr.bf16.mxu0 %v2381_v12 }
  0xe9   :  { %2179 = vmatmul.mubr.f32.vlgmr.msra.gmra.mrb[2].mxu1 %v1528_v49 }
  0xea   :  { %2263 = vmatpush3.bf16.msra.mxu1 %v2434_v22  ;;  %2185 = vmatprep.mubr.msk.f32.mxu1 %vm2382_vm0, %v2383_v15 }
  0xeb   :  { %2264 = vmatprep.subr.bf16.mxu1 %v2381_v12 }
  0xec   :  { %2144 = vmatmul.mubr.msk.f32.vlgmr.msra.gmra.mrb[2].mxu0 %vm37_vm1, %v2475_v41 }
  0xed   :  { %2248 = vmatpush3.bf16.msra.mxu0 %v2418_v9  ;;  %2150 = vmatprep.mubr.msk.f32.mxu0 %vm2382_vm0, %v2383_v15 }
  0xf1   :  { %2186 = vmatmul.mubr.msk.f32.vlgmr.msra.gmra.mrb[2].mxu1 %vm37_vm1, %v2484_v43 }
  0xf2   :  { %2266 = vmatpush3.bf16.msra.mxu1 %v2418_v9  ;;  %2192 = vmatprep.mubr.msk.f32.mxu1 %vm2382_vm0, %v2383_v15 }
  0xf4   :  { %2151 = vmatmul.mubr.msk.f32.vlgmr.msra.gmra.mrb[2].mxu0 %vm37_vm1, %v2475_v41 }
  0xf9   :  { %2193 = vmatmul.mubr.msk.f32.vlgmr.msra.gmra.mrb[2].mxu1 %vm37_vm1, %v2484_v43 }
 0x19b   :  { %v496_v53 = vpop.f32.mrb[0].mxu0 }
 0x19c   :  { %501 = vst.msk [vmem:[#allocation5] sm:$0xff] %vm500_vm6, %v496_v53  ;;  %v2068_v54 = vpop.f32.mrb[1].mxu0 }
 0x1a0   :  { %v966_v55 = vpop.f32.mrb[0].mxu1 }
 0x1a1   :  { %971 = vrot.lane.b32.xlu1 %v966_v55, %s2384_s0  ;;  %v2110_v56 = vpop.f32.mrb[1].mxu1 }
 0x1c7   :  { %v1440_v57 = vpop.f32.mrb[2].mxu0 }
 0x1c8   :  { %1445 = vrot.lane.b32.xlu0 %v1440_v57, %s2385_s1  ;;  %v2152_v58 = vpop.f32.mrb[3].mxu0 }
 0x1cc   :  { %v1914_v59 = vpop.f32.mrb[2].mxu1 }
 0x1cd   :  { %1919 = vrot.lane.b32.xlu1 %v1914_v59, %s2386_s25  ;;  %v2194_v60 = vpop.f32.mrb[3].mxu1 }
 0x213   :  { %v972_v61 = vpop.permute.xlu1 %971 }
 0x214   :  { %975 = vst.msk [vmem:[#allocation5] sm:$0xff] %vm974_vm7, %v972_v61 }
 0x23a   :  { %v1446_v62 = vpop.permute.xlu0 %1445 }
 0x23b   :  { %1449 = vst.msk [vmem:[#allocation5] sm:$0xff] %vm1448_vm8, %v1446_v62 }
 0x23f   :  { %v1920_v63 = vpop.permute.xlu1 %1919 }
 0x240   :  { %1923 = vst.msk [vmem:[#allocation5] sm:$0xff] %vm1922_vm9, %v1920_v63 }
 0x241   :  { %2359 = shalt.err (!%p2356_p12)
}
 0x242   :  { %s2360_s3 = scalar_lea.hbm %s2580_s2, 128 }
 0x243   :  { %p2361_p13 = scmp.ne.s32.totalorder %s2580_s2, %s2360_s3  ;;  %p2364_p0 = scmp.lt.u32.totalorder %s2360_s3, %s2580_s2 }
 0x245   :  { %p2366_p1 = pnand %p2364_p0, %p2361_p13 }
 0x247   :  { %2369 = shalt.err (!%p2366_p1)
}
 0x248   :  { %1933 = dma.vmem_to_hbm [thread:$0]  %s1931_s27, 128, %s2580_s2, [#allocation4]  }
 0x249   :  { %2372 = dma.done.wait [#allocation4], 128  }
 0x24a   :  { %2373 = vsyncadd [#allocation4], 4294967168 }
 0x24b   :  { %1937 = vsyncpa [#allocation3], 1 }
 0x24c   :  { %1938 = vsyncpa [#allocation4], 1 }

</bundles_post_ra>
